<compile_context>
chip_gen: v7x
topology: tpu7x:2x2x1
jax: 0.10.0
libtpu: 0.0.40
codegen_flags: <defaults>
</compile_context>

<pallas_src>
import math

import jax
import jax.numpy as jnp
from jax.experimental import pallas as pl
from jax.experimental.pallas import tpu as pltpu


# ---------------------------------------------------------------------------
# Fused kernel: the entire MLP in one body (weights resident in VMEM)
# ---------------------------------------------------------------------------

def _make_mlp_kernel(n_hidden, compute_dtype):
    """Kernel args: x_ref, w0, b0, w1, b1, ..., wL, bL, o_ref."""

    def kernel(x_ref, *refs):
        o_ref = refs[-1]
        wb = refs[:-1]
        h = x_ref[...]
        # Hidden layers: Linear -> ReLU (Dropout eval = id, BN folded into W/b).
        # Weights arrive already in compute_dtype (bf16); activations are cast
        # right before each dot, accumulation stays f32 on the MXU.
        for li in range(n_hidden):
            w = wb[2 * li][...]
            b = wb[2 * li + 1][...]
            z = jnp.dot(h.astype(compute_dtype), w,
                        preferred_element_type=jnp.float32) + b
            h = jnp.maximum(z, 0.0)
        # Final Linear (no activation).
        w = wb[-2][...]
        b = wb[-1][...]
        o_ref[...] = (jnp.dot(h.astype(compute_dtype), w,
                              preferred_element_type=jnp.float32) + b
                      ).astype(o_ref.dtype)

    return kernel


# ---------------------------------------------------------------------------
# One-time (cached) folding / padding of the parameters
# ---------------------------------------------------------------------------

def _round_up(n, m):
    return ((n + m - 1) // m) * m


def fold_bn_into_params(params, bn_scale, bn_shift):
    """Fold eval-BatchNorm (scale, shift) into the Linear weights.

    params: list of (W[in,out], b[1,out]); BN follows every layer but the last.
    Valid only when bn_scale > 0 on every channel (scale commutes with ReLU);
    the additive shift is pushed into the *next* layer's bias.
    """
    folded = []
    carry_shift = None
    n = len(params)
    for i, (w, b) in enumerate(params):
        if carry_shift is not None:
            b = b + carry_shift @ w            # (1,in) @ (in,out) -> (1,out)
        if i < n - 1:                          # hidden layer: BN follows
            w = w * bn_scale                   # (in,out) * (1,out)
            b = b * bn_scale
            carry_shift = bn_shift             # added after ReLU -> next bias
        folded.append((w, b))
    return folded


def prepare_mlp_params(params, bn_scale, bn_shift, compute_dtype=jnp.bfloat16):
    """Runs ONCE. Folds BN, pads feature dims to 128 lanes, casts weights to
    the MXU compute dtype. The result is reused for every forward call."""
    # The fold requires strictly positive BN scale on every channel.
    assert bool(jnp.all(bn_scale > 0)), (
        "BN fold requires bn_scale > 0 on every channel; apply BN in-kernel "
        "for trained gammas that are <= 0."
    )
    folded = fold_bn_into_params(params, bn_scale, bn_shift)

    dims = [params[0][0].shape[0]] + [w.shape[1] for w, _ in folded]
    # Keep the INPUT feature dim unpadded (Mosaic pads K internally); pad every
    # hidden/output dim to 128 so all matmul results / stores are lane-dense.
    pdims = [dims[0]] + [_round_up(d, 128) for d in dims[1:]]

    arrays = []
    for i, (w, b) in enumerate(folded):
        wp = jnp.pad(w, ((0, pdims[i] - w.shape[0]),
                         (0, pdims[i + 1] - w.shape[1]))).astype(compute_dtype)
        bp = jnp.pad(b, ((0, 0), (0, pdims[i + 1] - b.shape[1]))).astype(jnp.float32)
        arrays += [wp, bp]

    return {
        "arrays": tuple(arrays),
        "dims": tuple(dims),
        "pdims": tuple(pdims),
        "n_hidden": len(folded) - 1,
        "compute_dtype": compute_dtype,
    }


# ---------------------------------------------------------------------------
# Forward: single fused pallas_call over prepared params
# ---------------------------------------------------------------------------

def _batch_tiling(B, block_b):
    """Pick (tb, Bp, n_tiles): >= 2 tiles when batch allows (v7x megacore),
    tile <= block_b rows, minimal row over-padding."""
    B8 = _round_up(B, 8)
    max_tiles = max(1, B8 // 8)                      # each tile >= 8 rows
    n_tiles = min(max(2, pl.cdiv(B8, block_b)), max_tiles)
    tb = _round_up(pl.cdiv(B8, n_tiles), 8)
    Bp = _round_up(B8, tb)
    return tb, Bp


def benchmark_mlp_forward(x, prepared, *, block_b=512):
    arrays = prepared["arrays"]
    dims = prepared["dims"]
    pdims = prepared["pdims"]
    n_hidden = prepared["n_hidden"]
    compute_dtype = prepared["compute_dtype"]

    input_size = dims[0]
    x = x.reshape(-1, input_size).astype(jnp.float32)
    B = x.shape[0]

    tb, Bp = _batch_tiling(B, block_b)
    grid = (pl.cdiv(Bp, tb),)

    # Only row-pad (no feature pad) and only if the tile doesn't divide B.
    xp = x if Bp == B else jnp.pad(x, ((0, Bp - B), (0, 0)))

    # Block specs: batch-tiled activations, resident (constant index) weights.
    # (Scaling knob: add pipeline_mode=pl.Buffered(1) to the weight specs if
    #  the network grows and resident-weight VMEM becomes the limit on v7x.)
    in_specs = [pl.BlockSpec((tb, input_size), lambda i: (i, 0))]
    for arr in arrays:
        in_specs.append(pl.BlockSpec(arr.shape, lambda i: (0, 0)))
    out_spec = pl.BlockSpec((tb, pdims[-1]), lambda i: (i, 0))

    # Advisory cost estimate for XLA's scheduler.
    flops = 2 * Bp * sum(pdims[i] * pdims[i + 1] for i in range(len(pdims) - 1))
    weight_bytes = sum(int(a.size) * a.dtype.itemsize for a in arrays)
    bytes_accessed = 4 * Bp * (input_size + pdims[-1]) + weight_bytes
    cost = pl.CostEstimate(flops=flops, transcendentals=0,
                           bytes_accessed=bytes_accessed)

    # Scoped-VMEM limit from the actual footprint (double-buffered specs) with
    # headroom; matters on v5e (16 MiB scoped default) and v7x (64 MiB VMEM).
    act_bytes = tb * (input_size + pdims[-1]) * 4
    vmem_need = 2 * (weight_bytes + act_bytes)
    vmem_limit = int(min(max(4 * vmem_need, 16 * 1024 * 1024), 64 * 1024 * 1024))

    out = pl.pallas_call(
        _make_mlp_kernel(n_hidden, compute_dtype),
        out_shape=jax.ShapeDtypeStruct((Bp, pdims[-1]), jnp.float32),
        grid=grid,
        in_specs=in_specs,
        out_specs=out_spec,
        compiler_params=pltpu.CompilerParams(
            dimension_semantics=("parallel",),   # split batch tiles across TCs
            vmem_limit_bytes=vmem_limit,
        ),
        cost_estimate=cost,
    )(xp, *arrays)

    return out[:B, : dims[-1]]


# ---------------------------------------------------------------------------
# Parameter construction (deterministic, mirrors the PyTorch __init__)
# ---------------------------------------------------------------------------

def xavier_uniform(key, fan_in, fan_out):
    a = math.sqrt(6.0 / (fan_in + fan_out))
    # PyTorch weight shape is (out, in); we store the transpose (in, out).
    return jax.random.uniform(key, (fan_in, fan_out), jnp.float32, -a, a)


def linear_bias(key, fan_in, fan_out):
    bound = 1.0 / math.sqrt(fan_in)  # PyTorch default nn.Linear bias init
    return jax.random.uniform(key, (1, fan_out), jnp.float32, -bound, bound)


def make_params(key, input_size, hidden_sizes, output_size, n_layers):
    dims = (
        [input_size]
        + [hidden_sizes[0]]
        + [hidden_sizes[i + 1] for i in range(n_layers - 2)]
        + [output_size]
    )
    params = []
    for i in range(len(dims) - 1):
        key, kw, kb = jax.random.split(key, 3)
        params.append(
            (xavier_uniform(kw, dims[i], dims[i + 1]),
             linear_bias(kb, dims[i], dims[i + 1]))
        )
    return params


# ---------------------------------------------------------------------------
# Pure-JAX references (eval-mode PyTorch semantics)
# ---------------------------------------------------------------------------

def reference_forward_f32(x, params, bn_mean, bn_var, bn_gamma, bn_beta, eps=1e-5):
    """Bit-faithful f32 eval forward (unfolded BN)."""
    input_size = params[0][0].shape[0]
    x = x.reshape(-1, input_size).astype(jnp.float32)
    for w, b in params[:-1]:
        x = jnp.maximum(x @ w + b, 0.0)                       # Linear + ReLU
        # Dropout eval = identity.
        x = (x - bn_mean) / jnp.sqrt(bn_var + eps) * bn_gamma + bn_beta
    w, b = params[-1]
    return x @ w + b


def reference_forward_matched(x, params, bn_scale, bn_shift, compute_dtype):
    """Reference using the same folded params + bf16-operand / f32-accum dots
    as the kernel (isolates kernel correctness from dtype rounding)."""
    folded = fold_bn_into_params(params, bn_scale, bn_shift)
    input_size = folded[0][0].shape[0]
    h = x.reshape(-1, input_size).astype(jnp.float32)
    for w, b in folded[:-1]:
        z = jnp.dot(h.astype(compute_dtype), w.astype(compute_dtype),
                    preferred_element_type=jnp.float32) + b
        h = jnp.maximum(z, 0.0)
    w, b = folded[-1]
    return jnp.dot(h.astype(compute_dtype), w.astype(compute_dtype),
                   preferred_element_type=jnp.float32) + b


# ---------------------------------------------------------------------------
# Main
# ---------------------------------------------------------------------------

if __name__ == "__main__":
    input_size = 32
    hidden_sizes = [64, 64]
    output_size = 10
    n_layers = 3          # 2 hidden linears + 1 output linear
    dropout_p = 0.5       # identity in eval mode
    batch = 8
    eps = 1e-5

    # The PyTorch module applies ONE BatchNorm1d(hidden_sizes[0]) after every
    # hidden layer, so all hidden widths must equal hidden_sizes[0].
    assert all(h == hidden_sizes[0] for h in hidden_sizes), \
        "benchmark_MLP requires uniform hidden sizes (single BatchNorm1d)"

    key = jax.random.PRNGKey(0)
    kx, kp = jax.random.split(key)
    x = jax.random.normal(kx, (batch, input_size), jnp.float32)
    params = make_params(kp, input_size, hidden_sizes, output_size, n_layers)

    # Fresh eval-mode BatchNorm1d: running_mean=0, running_var=1, gamma=1, beta=0.
    h0 = hidden_sizes[0]
    bn_mean = jnp.zeros((1, h0), jnp.float32)
    bn_var = jnp.ones((1, h0), jnp.float32)
    bn_gamma = jnp.ones((1, h0), jnp.float32)
    bn_beta = jnp.zeros((1, h0), jnp.float32)
    bn_scale = bn_gamma / jnp.sqrt(bn_var + eps)
    bn_shift = bn_beta - bn_mean * bn_scale

    # One-time prep (fold BN, pad, cast weights to bf16) -- cached pytree.
    prepared = prepare_mlp_params(params, bn_scale, bn_shift,
                                  compute_dtype=jnp.bfloat16)

    fwd = jax.jit(lambda xx: benchmark_mlp_forward(xx, prepared))
    out = jax.block_until_ready(fwd(x))

    assert out.shape == (batch, output_size), out.shape

    # 1) Exactness vs. a reference that uses the identical folded/bf16 math.
    ref_matched = reference_forward_matched(x, params, bn_scale, bn_shift,
                                            jnp.bfloat16)
    assert jnp.allclose(out, ref_matched, atol=1e-4, rtol=1e-4), \
        "mismatch vs. matched (folded bf16) reference"

    # 2) Sanity vs. the full-f32 PyTorch-style eval forward (bf16 rounding).
    ref_f32 = reference_forward_f32(x, params, bn_mean, bn_var,
                                    bn_gamma, bn_beta, eps)
    assert jnp.allclose(out, ref_f32, atol=1e-1, rtol=5e-2), \
        "mismatch vs. f32 reference beyond bf16 tolerance"

    print("KERNEL_OK")
</pallas_src>

<mosaic_0001>
module attributes {stable_mosaic.version = 11 : i64} {
  func.func @kernel(%arg0: i32, %arg1: memref<8x32xf32, #tpu.memory_space<vmem>>, %arg2: memref<32x128xbf16, #tpu.memory_space<vmem>>, %arg3: memref<1x128xf32, #tpu.memory_space<vmem>>, %arg4: memref<128x128xbf16, #tpu.memory_space<vmem>>, %arg5: memref<1x128xf32, #tpu.memory_space<vmem>>, %arg6: memref<128x128xbf16, #tpu.memory_space<vmem>>, %arg7: memref<1x128xf32, #tpu.memory_space<vmem>>, %arg8: memref<8x128xf32, #tpu.memory_space<vmem>>) attributes {dimension_semantics = [#tpu.dimension_semantics<parallel>], iteration_bounds = array<i64: 1>, scalar_prefetch = 0 : i64, scratch_operands = 0 : i64, tpu.core_type = #tpu.core_type<tc>, window_params = [{transform_indices = @transform_0, window_bounds = array<i64: 8, 32>}, {pipeline_mode = #tpu.pipeline_mode<synchronous>, transform_indices = @transform_1, window_bounds = array<i64: 32, 128>}, {pipeline_mode = #tpu.pipeline_mode<synchronous>, transform_indices = @transform_2, window_bounds = array<i64: 1, 128>}, {pipeline_mode = #tpu.pipeline_mode<synchronous>, transform_indices = @transform_3, window_bounds = array<i64: 128, 128>}, {pipeline_mode = #tpu.pipeline_mode<synchronous>, transform_indices = @transform_4, window_bounds = array<i64: 1, 128>}, {pipeline_mode = #tpu.pipeline_mode<synchronous>, transform_indices = @transform_5, window_bounds = array<i64: 128, 128>}, {pipeline_mode = #tpu.pipeline_mode<synchronous>, transform_indices = @transform_6, window_bounds = array<i64: 1, 128>}, {transform_indices = @transform_7, window_bounds = array<i64: 8, 128>}]} {
    %c0 = arith.constant 0 : index
    %c0_0 = arith.constant 0 : index
    %0 = vector.load %arg1[%c0, %c0_0] : memref<8x32xf32, #tpu.memory_space<vmem>>, vector<8x32xf32>
    %c0_1 = arith.constant 0 : index
    %c0_2 = arith.constant 0 : index
    %1 = vector.load %arg2[%c0_1, %c0_2] : memref<32x128xbf16, #tpu.memory_space<vmem>>, vector<32x128xbf16>
    %c0_3 = arith.constant 0 : index
    %c0_4 = arith.constant 0 : index
    %2 = vector.load %arg3[%c0_3, %c0_4] : memref<1x128xf32, #tpu.memory_space<vmem>>, vector<1x128xf32>
    %3 = arith.truncf %0 : vector<8x32xf32> to vector<8x32xbf16>
    %cst = arith.constant dense<0.000000e+00> : vector<8x128xf32>
    %4 = tpu.matmul %3, %1, %cst {dimension_numbers = #tpu.dot_dimension_numbers<[1], [0], [0], [1], [0, 0, 1, 1], [], []>} : vector<8x32xbf16>, vector<32x128xbf16>, vector<8x128xf32> -> vector<8x128xf32>
    %5 = vector.broadcast %2 : vector<1x128xf32> to vector<8x128xf32>
    %6 = arith.addf %4, %5 : vector<8x128xf32>
    %cst_5 = arith.constant 0.000000e+00 : f32
    %7 = vector.broadcast %cst_5 : f32 to vector<8x128xf32>
    %8 = arith.maximumf %6, %7 : vector<8x128xf32>
    %c0_6 = arith.constant 0 : index
    %c0_7 = arith.constant 0 : index
    %9 = vector.load %arg4[%c0_6, %c0_7] : memref<128x128xbf16, #tpu.memory_space<vmem>>, vector<128x128xbf16>
    %c0_8 = arith.constant 0 : index
    %c0_9 = arith.constant 0 : index
    %10 = vector.load %arg5[%c0_8, %c0_9] : memref<1x128xf32, #tpu.memory_space<vmem>>, vector<1x128xf32>
    %11 = arith.truncf %8 : vector<8x128xf32> to vector<8x128xbf16>
    %cst_10 = arith.constant dense<0.000000e+00> : vector<8x128xf32>
    %12 = tpu.matmul %11, %9, %cst_10 {dimension_numbers = #tpu.dot_dimension_numbers<[1], [0], [0], [1], [0, 0, 1, 1], [], []>} : vector<8x128xbf16>, vector<128x128xbf16>, vector<8x128xf32> -> vector<8x128xf32>
    %13 = vector.broadcast %10 : vector<1x128xf32> to vector<8x128xf32>
    %14 = arith.addf %12, %13 : vector<8x128xf32>
    %cst_11 = arith.constant 0.000000e+00 : f32
    %15 = vector.broadcast %cst_11 : f32 to vector<8x128xf32>
    %16 = arith.maximumf %14, %15 : vector<8x128xf32>
    %c0_12 = arith.constant 0 : index
    %c0_13 = arith.constant 0 : index
    %17 = vector.load %arg6[%c0_12, %c0_13] : memref<128x128xbf16, #tpu.memory_space<vmem>>, vector<128x128xbf16>
    %c0_14 = arith.constant 0 : index
    %c0_15 = arith.constant 0 : index
    %18 = vector.load %arg7[%c0_14, %c0_15] : memref<1x128xf32, #tpu.memory_space<vmem>>, vector<1x128xf32>
    %19 = arith.truncf %16 : vector<8x128xf32> to vector<8x128xbf16>
    %cst_16 = arith.constant dense<0.000000e+00> : vector<8x128xf32>
    %20 = tpu.matmul %19, %17, %cst_16 {dimension_numbers = #tpu.dot_dimension_numbers<[1], [0], [0], [1], [0, 0, 1, 1], [], []>} : vector<8x128xbf16>, vector<128x128xbf16>, vector<8x128xf32> -> vector<8x128xf32>
    %21 = vector.broadcast %18 : vector<1x128xf32> to vector<8x128xf32>
    %22 = arith.addf %20, %21 : vector<8x128xf32>
    %c0_17 = arith.constant 0 : index
    %c0_18 = arith.constant 0 : index
    %23 = vector.load %arg8[%c0_17, %c0_18] : memref<8x128xf32, #tpu.memory_space<vmem>>, vector<8x128xf32>
    tpu.vector_store %arg8[%c0_17, %c0_18], %22 {strides = array<i32>} : memref<8x128xf32, #tpu.memory_space<vmem>>, vector<8x128xf32>,
    return
  }
  func.func @transform_0(%arg0: i32) -> (i32, i32) {
    %c0_i32 = arith.constant 0 : i32
    %c0_i32_0 = arith.constant 0 : i32
    return %arg0, %c0_i32 : i32, i32
  }
  func.func @transform_1(%arg0: i32) -> (i32, i32) {
    %c0_i32 = arith.constant 0 : i32
    %c0_i32_0 = arith.constant 0 : i32
    %c0_i32_1 = arith.constant 0 : i32
    return %c0_i32, %c0_i32_0 : i32, i32
  }
  func.func @transform_2(%arg0: i32) -> (i32, i32) {
    %c0_i32 = arith.constant 0 : i32
    %c0_i32_0 = arith.constant 0 : i32
    %c0_i32_1 = arith.constant 0 : i32
    return %c0_i32, %c0_i32_0 : i32, i32
  }
  func.func @transform_3(%arg0: i32) -> (i32, i32) {
    %c0_i32 = arith.constant 0 : i32
    %c0_i32_0 = arith.constant 0 : i32
    %c0_i32_1 = arith.constant 0 : i32
    return %c0_i32, %c0_i32_0 : i32, i32
  }
  func.func @transform_4(%arg0: i32) -> (i32, i32) {
    %c0_i32 = arith.constant 0 : i32
    %c0_i32_0 = arith.constant 0 : i32
    %c0_i32_1 = arith.constant 0 : i32
    return %c0_i32, %c0_i32_0 : i32, i32
  }
  func.func @transform_5(%arg0: i32) -> (i32, i32) {
    %c0_i32 = arith.constant 0 : i32
    %c0_i32_0 = arith.constant 0 : i32
    %c0_i32_1 = arith.constant 0 : i32
    return %c0_i32, %c0_i32_0 : i32, i32
  }
  func.func @transform_6(%arg0: i32) -> (i32, i32) {
    %c0_i32 = arith.constant 0 : i32
    %c0_i32_0 = arith.constant 0 : i32
    %c0_i32_1 = arith.constant 0 : i32
    return %c0_i32, %c0_i32_0 : i32, i32
  }
  func.func @transform_7(%arg0: i32) -> (i32, i32) {
    %c0_i32 = arith.constant 0 : i32
    %c0_i32_0 = arith.constant 0 : i32
    return %arg0, %c0_i32 : i32, i32
  }
}

</mosaic_0001>

<bundles_post_ra>
// kernel: _lambda_.1
= control target key start
LH: loop header
LB: loop body
LE: loop exit
PB: predicated region body
PF: predicated region fallthrough
CT: control target
= control target key end

     0   :  { %12 = vsyncpa [#allocation3], 0  ;;  %s731_s0 = inlined_call_operand.vmem [shape: f32[8,32], index: 0, kind: input, shape index: {}]   ;;  %s732_s1 = inlined_call_operand.vmem [shape: bf16[32,128], index: 1, kind: input, shape index: {}]   ;;  %s733_s2 = inlined_call_operand.hbm [shape: f32[1,128], index: 2, kind: input, shape index: {}]   ;;  %s734_s3 = inlined_call_operand.hbm [shape: bf16[128,128], index: 3, kind: input, shape index: {}]   ;;  %s735_s4 = inlined_call_operand.vmem [shape: f32[1,128], index: 4, kind: input, shape index: {}]   ;;  %s736_s5 = inlined_call_operand.hbm [shape: bf16[128,128], index: 5, kind: input, shape index: {}]   ;;  %s737_s6 = inlined_call_operand.vmem [shape: f32[1,128], index: 6, kind: input, shape index: {}]   ;;  %s738_s7 = inlined_call_operand.hbm [shape: f32[8,128], index: 7, kind: output, shape index: {}]  }
   0x1   :  { %13 = vsyncpa [#allocation6], 0 }
   0x2   :  { %14 = vsyncpa [#allocation4], 0  ;;  %s590_s24 = smov [#allocation5]   ;;  %s496_s28 = scalar_lea.hbm %s734_s3, 1024 }
   0x3   :  { %s34_s25 = sshll.u32 %s590_s24, 4  ;;  %p497_p0 = scmp.ne.s32.totalorder %s734_s3, %s496_s28  ;;  %s35_s25 = int_to_ptr.vmem [resolvable:$true] %s34_s25 }
   0x4   :  { %p500_p1 = scmp.lt.u32.totalorder %s496_s28, %s734_s3 }
   0x6   :  { %p502_p2 = pnand %p500_p1, %p497_p0 }
   0x8   :  { %505 = shalt.err (!%p502_p2)
}
   0x9   :  { %s506_s10 = scalar_lea.vmem %s35_s25, 1024  ;;  %p511_p4 = scmp.lt.s32.totalorder %s35_s25, %s35_s25 }
   0xa   :  { %p507_p3 = scmp.ne.s32.totalorder %s35_s25, %s506_s10  ;;  %p512_p5 = scmp.lt.s32.totalorder %s506_s10, %s506_s10 }
   0xc   :  { %p513_p6 = por %p512_p5, %p511_p4 }
   0xe   :  { %p514_p7 = pnand %p513_p6, %p507_p3 }
  0x10   :  { %517 = shalt.err (!%p514_p7)
}
  0x11   :  { %s591_s11 = smov 64   ;;  %s592_s12 = smov 4  }
  0x12   :  { %40 = dma.hbm_to_vmem [thread:$0]  %s734_s3, 1024, %s35_s25, [#allocation6], %s591_s11, %s591_s11, %s592_s12  }
  0x13   :  { %s593_s15 = smov [#allocation2]   ;;  %s594_s17 = smov [#allocation7]  }
  0x14   :  { %s25_s16 = sshll.u32 %s593_s15, 4  ;;  %s48_s18 = sshll.u32 %s594_s17, 4  ;;  %s26_s16 = int_to_ptr.vmem [resolvable:$true] %s25_s16  ;;  %s49_s18 = int_to_ptr.vmem [resolvable:$true] %s48_s18 }
  0x15   :  { %s518_s21 = scalar_lea.hbm %s733_s2, 16 }
  0x16   :  { %p519_p8 = scmp.ne.s32.totalorder %s733_s2, %s518_s21  ;;  %p522_p9 = scmp.lt.u32.totalorder %s518_s21, %s733_s2 }
  0x18   :  { %p524_p10 = pnand %p522_p9, %p519_p8 }
  0x1a   :  { %527 = shalt.err (!%p524_p10)
}
  0x1b   :  { %s528_s3 = scalar_lea.vmem %s26_s16, 16  ;;  %s532_s25 = scalar_lea.vmem %s26_s16, 32 }
  0x1c   :  { %p529_p11 = scmp.ne.s32.totalorder %s26_s16, %s528_s3  ;;  %p533_p12 = scmp.lt.s32.totalorder %s26_s16, %s26_s16 }
  0x1d   :  { %p534_p13 = scmp.lt.s32.totalorder %s532_s25, %s528_s3 }
  0x1f   :  { %p535_p0 = por %p534_p13, %p533_p12 }
  0x21   :  { %p536_p1 = pnand %p535_p0, %p529_p11 }
  0x23   :  { %539 = shalt.err (!%p536_p1)
}
  0x24   :  { %28 = dma.hbm_to_vmem [thread:$0]  %s733_s2, 16, %s26_s16, [#allocation3]  }
  0x25   :  { %s540_s8 = scalar_lea.hbm %s736_s5, 1024 }
  0x26   :  { %p541_p2 = scmp.ne.s32.totalorder %s736_s5, %s540_s8  ;;  %p544_p3 = scmp.lt.u32.totalorder %s540_s8, %s736_s5 }
  0x28   :  { %p546_p4 = pnand %p544_p3, %p541_p2 }
  0x2a   :  { %549 = shalt.err (!%p546_p4)
}
  0x2b   :  { %s550_s15 = scalar_lea.vmem %s49_s18, 1024  ;;  %p555_p6 = scmp.lt.s32.totalorder %s49_s18, %s49_s18 }
  0x2c   :  { %p551_p5 = scmp.ne.s32.totalorder %s49_s18, %s550_s15  ;;  %p556_p7 = scmp.lt.s32.totalorder %s550_s15, %s550_s15 }
  0x2e   :  { %p557_p8 = por %p556_p7, %p555_p6 }
  0x30   :  { %p558_p9 = pnand %p557_p8, %p551_p5 }
  0x32   :  { %561 = shalt.err (!%p558_p9)
}
  0x33   :  { %54 = dma.hbm_to_vmem [thread:$0]  %s736_s5, 1024, %s49_s18, [#allocation6], %s591_s11, %s591_s11, %s592_s12  }
  0x34   :  { %584 = dma.done.wait [#allocation3], 16  }
  0x35   :  { %585 = vsyncadd [#allocation3], 4294967280 }
  0x36   :  { %586 = dma.done.wait [#allocation6], 2048  }
  0x37   :  { %587 = vsyncadd [#allocation6], 4294965248  ;;  %v595_v0 = vmov 0.0   ;;  %vm596_vm0 = vmmov 0   ;;  %v478_v1 = vld [vmem:[%s732_s1] sm:$0xff]   ;;  %v479_v2 = vld [vmem:[%s732_s1 + $0x8] sm:$0xff]  }
  0x38   :  { %422 = vmatprep.subr.bf16.mxu0 %v595_v0  ;;  %426 = vmatprep.mubr.msk.bf16.mxu0 %vm596_vm0, %v595_v0  ;;  %v67_v3 = vld [vmem:[%s731_s0] sm:$0xff]  ;;  %v481_v6 = vld [vmem:[#allocation5 + $0x8] sm:$0xff]   ;;  %vm92_vm1 = vcmask 261120   ;;  %v482_v7 = vld [vmem:[#allocation5 + $0x10] sm:$0xff]   ;;  %s597_s22 = smov [#allocation8]  }
  0x39   :  { %430 = vmatprep.subr.bf16.mxu1 %v595_v0  ;;  %446 = vmatprep.mubr.msk.bf16.mxu1 %vm596_vm0, %v595_v0  ;;  %v480_v4 = vld [vmem:[#allocation5] sm:$0xff]   ;;  %v73_v5 = vpack.c.bf16 %v67_v3, %v67_v3  ;;  %v483_v8 = vld [vmem:[#allocation5 + $0x18] sm:$0xff]   ;;  %v485_v10 = vld [vmem:[#allocation5 + $0x28] sm:$0xff]   ;;  %s369_s23 = sshll.u32 %s597_s22, 4  ;;  %s370_s23 = int_to_ptr.vmem [resolvable:$true] %s369_s23 }
  0x3a   :  { %423 = vmatpush3.bf16.msra.mxu0 %v478_v1  ;;  %431 = vmatpush3.bf16.msra.mxu1 %v480_v4  ;;  %v484_v9 = vld [vmem:[#allocation5 + $0x20] sm:$0xff]   ;;  %v486_v11 = vld [vmem:[#allocation5 + $0x30] sm:$0xff]   ;;  %v487_v12 = vld [vmem:[#allocation5 + $0x38] sm:$0xff]   ;;  %p567_p11 = scmp.lt.s32.totalorder %s370_s23, %s370_s23 }
  0x3b   :  { %424 = vmatprep.subr.bf16.mxu0 %v595_v0  ;;  %432 = vmatprep.subr.bf16.mxu1 %v595_v0  ;;  %v488_v13 = vld [vmem:[#allocation7] sm:$0xff]   ;;  %v489_v14 = vld [vmem:[#allocation7 + $0x8] sm:$0xff]   ;;  %v490_v15 = vld [vmem:[#allocation7 + $0x10] sm:$0xff]  }
  0x3c   :  { %v491_v16 = vld [vmem:[#allocation7 + $0x18] sm:$0xff]   ;;  %v492_v17 = vld [vmem:[#allocation7 + $0x20] sm:$0xff]   ;;  %v493_v18 = vld [vmem:[#allocation7 + $0x28] sm:$0xff]  }
  0x3d   :  { %v379_v19 = vld [vmem:[#allocation2] ss:$0 sm:$0xff]  ;;  %v494_v27 = vld [vmem:[#allocation7 + $0x30] sm:$0xff]  }
  0x3e   :  { %425 = vmatpush3.bf16.msra.mxu0 %v479_v2  ;;  %433 = vmatpush3.bf16.msra.mxu1 %v481_v6  ;;  %v495_v28 = vld [vmem:[#allocation7 + $0x38] sm:$0xff]  }
  0x3f   :  { %450 = vmatprep.subr.bf16.mxu0 %v595_v0  ;;  %434 = vmatprep.subr.bf16.mxu1 %v595_v0  ;;  %v383_v29 = vld [vmem:[%s735_s4] ss:$0 sm:$0xff]  ;;  %s562_s4 = scalar_lea.vmem %s370_s23, 128 }
  0x40   :  { %v392_v37 = vld [vmem:[%s737_s6] ss:$0 sm:$0xff]  ;;  %p563_p10 = scmp.ne.s32.totalorder %s370_s23, %s562_s4  ;;  %p568_p12 = scmp.lt.s32.totalorder %s562_s4, %s562_s4 }
  0x41   :  { %427 = vmatmul.mubr.msk.bf16.vlgmr.msra.gmra.mrb[0].mxu0 %vm92_vm1, %v73_v5 }
  0x42   :  { %466 = vmatprep.mubr.msk.bf16.mxu0 %vm596_vm0, %v595_v0  ;;  %435 = vmatpush3.bf16.msra.mxu1 %v482_v7  ;;  %p569_p13 = por %p568_p12, %p567_p11 }
  0x43   :  { %436 = vmatprep.subr.bf16.mxu1 %v595_v0  ;;  %451 = vmatpush3.bf16.msra.mxu0 %v488_v13 }
  0x44   :  { %452 = vmatprep.subr.bf16.mxu0 %v595_v0  ;;  %p570_p0 = pnand %p569_p13, %p563_p10 }
  0x46   :  { %437 = vmatpush3.bf16.msra.mxu1 %v483_v8 }
  0x47   :  { %438 = vmatprep.subr.bf16.mxu1 %v595_v0  ;;  %453 = vmatpush3.bf16.msra.mxu0 %v489_v14 }
  0x48   :  { %454 = vmatprep.subr.bf16.mxu0 %v595_v0 }
  0x4a   :  { %439 = vmatpush3.bf16.msra.mxu1 %v484_v9 }
  0x4b   :  { %440 = vmatprep.subr.bf16.mxu1 %v595_v0  ;;  %455 = vmatpush3.bf16.msra.mxu0 %v490_v15 }
  0x4c   :  { %456 = vmatprep.subr.bf16.mxu0 %v595_v0 }
  0x4e   :  { %441 = vmatpush3.bf16.msra.mxu1 %v485_v10 }
  0x4f   :  { %442 = vmatprep.subr.bf16.mxu1 %v595_v0  ;;  %457 = vmatpush3.bf16.msra.mxu0 %v491_v16 }
  0x50   :  { %458 = vmatprep.subr.bf16.mxu0 %v595_v0 }
  0x52   :  { %443 = vmatpush3.bf16.msra.mxu1 %v486_v11 }
  0x53   :  { %444 = vmatprep.subr.bf16.mxu1 %v595_v0  ;;  %459 = vmatpush3.bf16.msra.mxu0 %v492_v17 }
  0x54   :  { %460 = vmatprep.subr.bf16.mxu0 %v595_v0 }
  0x56   :  { %445 = vmatpush3.bf16.msra.mxu1 %v487_v12 }
  0x57   :  { %461 = vmatpush3.bf16.msra.mxu0 %v493_v18 }
  0x58   :  { %462 = vmatprep.subr.bf16.mxu0 %v595_v0 }
  0x5b   :  { %463 = vmatpush3.bf16.msra.mxu0 %v494_v27 }
  0x5c   :  { %464 = vmatprep.subr.bf16.mxu0 %v595_v0 }
  0x5f   :  { %465 = vmatpush3.bf16.msra.mxu0 %v495_v28 }
 0x114   :  { %v130_v20 = vpop.f32.mrb[0].mxu0 }
 0x115   :  { %v131_v21 = vadd.f32 %v379_v19, %v130_v20  ;;  %v428_v22 = vpop.f32.mrb[1].mxu0 }
 0x116   :  { %v133_v23 = vpop.f32.mrb[2].mxu0 }
 0x117   :  { %v136_v24 = vmax.f32 %v131_v21, 0.0  ;;  %v429_v25 = vpop.f32.mrb[3].mxu0 }
 0x119   :  { %v154_v26 = vpack.c.bf16 %v136_v24, %v136_v24 }
 0x11b   :  { %447 = vmatmul.mubr.bf16.vlgmr.msra.gmra.mrb[0].mxu1 %v154_v26 }
 0x1ee   :  { %v243_v30 = vpop.f32.mrb[0].mxu1 }
 0x1ef   :  { %v244_v31 = vadd.f32 %v383_v29, %v243_v30  ;;  %v448_v32 = vpop.f32.mrb[1].mxu1 }
 0x1f0   :  { %v246_v33 = vpop.f32.mrb[2].mxu1 }
 0x1f1   :  { %v249_v34 = vmax.f32 %v244_v31, 0.0  ;;  %v449_v35 = vpop.f32.mrb[3].mxu1 }
 0x1f3   :  { %v267_v36 = vpack.c.bf16 %v249_v34, %v249_v34 }
 0x1f5   :  { %467 = vmatmul.mubr.bf16.vlgmr.msra.gmra.mrb[4].mxu0 %v267_v36 }
 0x2c8   :  { %v356_v38 = vpop.f32.mrb[4].mxu0 }
 0x2c9   :  { %v357_v39 = vadd.f32 %v392_v37, %v356_v38  ;;  %v468_v40 = vpop.f32.mrb[5].mxu0 }
 0x2ca   :  { %v359_v41 = vpop.f32.mrb[6].mxu0 }
 0x2cb   :  { %362 = vst [vmem:[#allocation8] sm:$0xff] %v357_v39  ;;  %v469_v42 = vpop.f32.mrb[7].mxu0 }
 0x2cc   :  { %573 = shalt.err (!%p570_p0)
}
 0x2cd   :  { %s574_s6 = scalar_lea.hbm %s738_s7, 128 }
 0x2ce   :  { %p575_p1 = scmp.ne.s32.totalorder %s738_s7, %s574_s6  ;;  %p578_p2 = scmp.lt.u32.totalorder %s574_s6, %s738_s7 }
 0x2d0   :  { %p580_p3 = pnand %p578_p2, %p575_p1 }
 0x2d2   :  { %583 = shalt.err (!%p580_p3)
}
 0x2d3   :  { %372 = dma.vmem_to_hbm [thread:$0]  %s370_s23, 128, %s738_s7, [#allocation4]  }
 0x2d4   :  { %588 = dma.done.wait [#allocation4], 128  }
 0x2d5   :  { %589 = vsyncadd [#allocation4], 4294967168 }
 0x2d6   :  { %376 = vsyncpa [#allocation3], 1 }
 0x2d7   :  { %377 = vsyncpa [#allocation6], 1 }
 0x2d8   :  { %378 = vsyncpa [#allocation4], 1 }

</bundles_post_ra>
